<compile_context>
chip_gen: v5e
topology: v5e:2x2
jax: 0.10.0
libtpu: 0.0.40
codegen_flags: <defaults>
</compile_context>

<pallas_src>
import functools

import jax
import jax.numpy as jnp
from jax.experimental import pallas as pl
from jax.experimental.pallas import tpu as pltpu

_SCALE = 1.7997442
_TWO_SCALE = 2.0 * _SCALE


def _action_projector_kernel(actions_ref, out_ref, *, hw):
    # actions_ref: (2*B,) float32 in SMEM (scalar reads: [2b] = dx, [2b+1] = dy)
    # out_ref:     (B, lanes) float32 in VMEM, lanes = round_up(2*hw, 128)
    B, lanes = out_ref.shape

    # Lane selector: lanes [0, hw) take dx, lanes [hw, lanes) take dy.
    # (Padding lanes beyond 2*hw carry dy values and are sliced off in the
    # wrapper — keeps every store a full-width, unmasked lane store.)
    lane = jax.lax.broadcasted_iota(jnp.int32, (1, lanes), 1)
    is_dx = lane < hw

    for b in range(B):  # B is static at trace time (small batch)
        dx_raw = actions_ref[2 * b]
        dy_raw = actions_ref[2 * b + 1]
        # Scalar -> vector splat via VPU select, then normalize on the vector
        # with a true divide to match the PyTorch reference exactly.
        raw = jnp.where(is_dx, dx_raw, dy_raw)
        out_ref[pl.ds(b, 1), :] = ((raw + _SCALE) / _TWO_SCALE).astype(out_ref.dtype)


def action_projector(actions: jax.Array, H: int = 8, W: int = 8) -> jax.Array:
    """actions: (B, 2) -> (B, 2, H, W) float32 action planes."""
    B, C = actions.shape
    assert C == 2, "expected actions of shape (B, 2)"
    hw = H * W

    # Lane-dense output slab: last dim padded up to a multiple of 128 lanes so
    # the in-kernel stores are never masked vst.msk partial stores.
    lanes = max(128, pl.cdiv(2 * hw, 128) * 128)

    actions_flat = actions.astype(jnp.float32).reshape(2 * B)

    slab = pl.pallas_call(
        functools.partial(_action_projector_kernel, hw=hw),
        out_shape=jax.ShapeDtypeStruct((B, lanes), jnp.float32),
        in_specs=[pl.BlockSpec(memory_space=pltpu.MemorySpace.SMEM)],
        out_specs=pl.BlockSpec(memory_space=pltpu.MemorySpace.VMEM),
    )(actions_flat)

    # Drop lane padding (no-op for the default H=W=8), then row-major reshape:
    # slab[b, :hw] -> channel 0 (dx plane), slab[b, hw:2*hw] -> channel 1 (dy).
    return slab[:, : 2 * hw].reshape(B, 2, H, W)


def _reference(actions: jax.Array, H: int = 8, W: int = 8) -> jax.Array:
    """Pure-JAX reference mirroring the PyTorch forward."""
    a = actions.astype(jnp.float32)
    dx = (a[:, 0] + _SCALE) / _TWO_SCALE
    dy = (a[:, 1] + _SCALE) / _TWO_SCALE
    dx_plane = jnp.broadcast_to(dx[:, None, None, None], (a.shape[0], 1, H, W))
    dy_plane = jnp.broadcast_to(dy[:, None, None, None], (a.shape[0], 1, H, W))
    return jnp.concatenate([dx_plane, dy_plane], axis=1)


if __name__ == "__main__":
    key = jax.random.PRNGKey(0)
    B, H, W = 2, 8, 8
    actions = jax.random.normal(key, (B, 2), dtype=jnp.float32)

    out = action_projector(actions, H=H, W=W)
    out = jax.block_until_ready(out)

    ref = _reference(actions, H=H, W=W)
    assert out.shape == (B, 2, H, W), out.shape
    assert out.dtype == jnp.float32, out.dtype
    assert jnp.allclose(out, ref, atol=1e-6, rtol=1e-6), "mismatch vs reference"

    print("KERNEL_OK")
</pallas_src>

<mosaic_0001>
module attributes {stable_mosaic.version = 11 : i64} {
  func.func @_action_projector_kernel(%arg0: memref<4xf32, #tpu.memory_space<smem>>, %arg1: memref<2x128xf32, #tpu.memory_space<vmem>>) attributes {dimension_semantics = [], scalar_prefetch = 0 : i64, scratch_operands = 0 : i64, tpu.core_type = #tpu.core_type<tc>} {
    %0 = tpu.iota {dimensions = array<i32: 1>} : vector<1x128xi32>
    %c64_i32 = arith.constant 64 : i32
    %1 = vector.broadcast %c64_i32 : i32 to vector<1x128xi32>
    %2 = arith.cmpi slt, %0, %1 : vector<1x128xi32>
    %c0 = arith.constant 0 : index
    %3 = memref.load %arg0[%c0] : memref<4xf32, #tpu.memory_space<smem>>
    %c1 = arith.constant 1 : index
    %4 = memref.load %arg0[%c1] : memref<4xf32, #tpu.memory_space<smem>>
    %5 = vector.broadcast %3 : f32 to vector<1x128xf32>
    %6 = vector.broadcast %4 : f32 to vector<1x128xf32>
    %7 = arith.select %2, %5, %6 : vector<1x128xi1>, vector<1x128xf32>
    %cst = arith.constant 1.79974425 : f32
    %8 = vector.broadcast %cst : f32 to vector<1x128xf32>
    %9 = arith.addf %7, %8 : vector<1x128xf32>
    %cst_0 = arith.constant 3.5994885 : f32
    %10 = vector.broadcast %cst_0 : f32 to vector<1x128xf32>
    %11 = arith.divf %9, %10 : vector<1x128xf32>
    %c0_1 = arith.constant 0 : index
    %c0_2 = arith.constant 0 : index
    %12 = vector.load %arg1[%c0_1, %c0_2] : memref<2x128xf32, #tpu.memory_space<vmem>>, vector<1x128xf32>
    tpu.vector_store %arg1[%c0_1, %c0_2], %11 {strides = array<i32>} : memref<2x128xf32, #tpu.memory_space<vmem>>, vector<1x128xf32>,
    %c2 = arith.constant 2 : index
    %13 = memref.load %arg0[%c2] : memref<4xf32, #tpu.memory_space<smem>>
    %c3 = arith.constant 3 : index
    %14 = memref.load %arg0[%c3] : memref<4xf32, #tpu.memory_space<smem>>
    %15 = vector.broadcast %13 : f32 to vector<1x128xf32>
    %16 = vector.broadcast %14 : f32 to vector<1x128xf32>
    %17 = arith.select %2, %15, %16 : vector<1x128xi1>, vector<1x128xf32>
    %cst_3 = arith.constant 1.79974425 : f32
    %18 = vector.broadcast %cst_3 : f32 to vector<1x128xf32>
    %19 = arith.addf %17, %18 : vector<1x128xf32>
    %cst_4 = arith.constant 3.5994885 : f32
    %20 = vector.broadcast %cst_4 : f32 to vector<1x128xf32>
    %21 = arith.divf %19, %20 : vector<1x128xf32>
    %c1_5 = arith.constant 1 : index
    %c0_6 = arith.constant 0 : index
    %22 = vector.load %arg1[%c1_5, %c0_6] : memref<2x128xf32, #tpu.memory_space<vmem>>, vector<1x128xf32>
    tpu.vector_store %arg1[%c1_5, %c0_6], %21 {strides = array<i32>} : memref<2x128xf32, #tpu.memory_space<vmem>>, vector<1x128xf32>,
    return
  }
}

</mosaic_0001>

<bundles_post_ra>
// kernel: tpu_custom_call.1
= control target key start
LH: loop header
LB: loop body
LE: loop exit
PB: predicated region body
PF: predicated region fallthrough
CT: control target
= control target key end

     0   :  { %6 = vsyncpa [#allocation4], 0  ;;  %s132_s0 = inlined_call_operand.hbm [shape: f32[4], index: 0, kind: input, shape index: {}]   ;;  %s133_s1 = inlined_call_operand.hbm [shape: f32[2,128], index: 1, kind: output, shape index: {}]  }
   0x1   :  { %7 = vsyncpa [#allocation3], 0  ;;  %s13_s8 = sshll.u32 %s132_s0, 4  ;;  %s113_s9 = smov [#allocation2]   ;;  %s14_s8 = int_to_ptr.hbm [resolvable:$true] %s13_s8 }
   0x2   :  { %16 = dma.hbm_to_smem %s14_s8, 16, %s113_s9, [#allocation4]  }
   0x3   :  { %109 = dma.done.wait [#allocation4], 16  }
   0x4   :  { %110 = vsyncadd [#allocation4], 4294967280 }
   0x5   :  { %21 = sfence }
   0x6   :  { %v22_v0 = vlaneseq  ;;  %s25_s10 = sld [smem:[#allocation2]]  ;;  %v114_v1 = vmov 3.5994885   ;;  %s115_s0 = smov [#allocation5]  }
   0x7   :  { %s65_s11 = sld [smem:[#allocation2 + $0x1]]  ;;  %71 = vrcp.f32 %v114_v1  ;;  %s53_s14 = sshll.u32 %s115_s0, 4  ;;  %s54_s14 = int_to_ptr.vmem [resolvable:$true] %s53_s14 }
   0x8   :  { %s66_s12 = sld [smem:[#allocation2 + $0x2]]  ;;  %v23_v2 = vand.u32 127, %v22_v0  ;;  %s55_s17 = sshll.u32 %s133_s1, 4  ;;  %s56_s17 = int_to_ptr.hbm [resolvable:$true] %s55_s17 }
   0x9   :  { %s67_s13 = sld [smem:[#allocation2 + $0x3]] }
   0xa   :  { %vm24_vm0 = vcmp.lt.s32.totalorder %v23_v2, 64 }
   0xc   :  { %v27_v4 = vstv %s25_s10 }
   0xd   :  { %v72_v3 = vpop.eup %71  ;;  %v28_v5 = vstv %s65_s11 }
   0xe   :  { %v32_v6 = vmul.f32 3.5994885, %v72_v3  ;;  %v42_v7 = vstv %s66_s12  ;;  %v29_v9 = vsel %vm24_vm0, %v27_v4, %v28_v5  ;;  %vm36_vm1 = vweird.f32 %v72_v3 }
   0xf   :  { %v43_v8 = vstv %s67_s13  ;;  %v30_v13 = vadd.f32 1.7997442, %v29_v9 }
  0x10   :  { %v33_v10 = vsub.f32 1.0, %v32_v6  ;;  %v44_v11 = vsel %vm24_vm0, %v42_v7, %v43_v8 }
  0x11   :  { %v45_v14 = vadd.f32 1.7997442, %v44_v11 }
  0x12   :  { %v34_v12 = vmul.f32 %v72_v3, %v33_v10 }
  0x14   :  { %v35_v15 = vadd.f32 %v72_v3, %v34_v12 }
  0x16   :  { %v37_v16 = vsel %vm36_vm1, %v72_v3, %v35_v15 }
  0x17   :  { %v38_v17 = vmul.f32 %v37_v16, %v30_v13  ;;  %v46_v18 = vmul.f32 %v45_v14, %v37_v16 }
  0x19   :  { %39 = vst [vmem:[#allocation5] sm:$0x1] %v38_v17 }
  0x1a   :  { %47 = vst [vmem:[#allocation5 + $0x1] sm:$0x1] %v46_v18 }
  0x1b   :  { %58 = dma.vmem_to_hbm [thread:$0]  %s54_s14, 32, %s56_s17, [#allocation3]  }
  0x1c   :  { %111 = dma.done.wait [#allocation3], 32  }
  0x1d   :  { %112 = vsyncadd [#allocation3], 4294967264 }
  0x1e   :  { %63 = vsyncpa [#allocation3], 1 }
  0x1f   :  { %64 = vsyncpa [#allocation4], 1 }

</bundles_post_ra>
